<compile_context>
chip_gen: v6e
topology: v6e:2x2x1
jax: 0.10.0
libtpu: 0.0.40
codegen_flags: <defaults>
</compile_context>

<pallas_src>
import numpy as np
import jax
import jax.numpy as jnp
from jax import lax
from jax.experimental import pallas as pl
from jax.experimental.pallas import tpu as pltpu

BN_EPS = 1e-5  # nn.BatchNorm2d default

# bf16 operands + f32 accumulation is the full-rate MXU path on all three generations.
MATMUL_DTYPE = jnp.bfloat16


def _pcbr_kernel(x_ref, pt_ref, w_ref, gamma_ref, beta_ref, out_ref):
    """All blocks resident in VMEM.

    x_ref:     (C_in, N*H*W)   bf16, column index = n*H*W + h*W + w
    pt_ref:    (H*W, S)        bf16, adaptive-avg-pool matrix (transposed), S = OH*OW
    w_ref:     (tile_co, C_in) bf16, 1x1-conv weight rows for this C_out tile
    gamma_ref: (tile_co, 1)    f32, BN weight
    beta_ref:  (tile_co, 1)    f32, BN bias
    out_ref:   (tile_co, N*S)  f32, column index = n*S + oh*OW + ow
    """
    hw = pt_ref.shape[0]
    s = pt_ref.shape[1]
    n_s = out_ref.shape[1]
    n_batch = n_s // s
    inv_cnt = 1.0 / float(n_s)

    # --- adaptive average pool: per-sample MXU matmuls on aligned static lane slices ---
    parts = []
    for n in range(n_batch):  # static trip count, unrolled at trace time
        xn = x_ref[:, n * hw:(n + 1) * hw]                       # (C_in, H*W) bf16
        parts.append(jnp.dot(xn, pt_ref[...],
                             preferred_element_type=jnp.float32))  # (C_in, S) f32 acc
    pooled = parts[0] if n_batch == 1 else jnp.concatenate(parts, axis=-1)  # (C_in, N*S)

    # --- 1x1 conv: ONE (tile_co, C_in) @ (C_in, N*S) MXU matmul, f32 accumulation ---
    y = jnp.dot(w_ref[...], pooled.astype(w_ref.dtype),
                preferred_element_type=jnp.float32)              # (tile_co, N*S)

    # --- BatchNorm2d, training-mode biased batch stats over (N, OH, OW) ---
    # Per-channel = per-row; lane reductions go to the XLU, rsqrt to the EUP.
    mu = jnp.sum(y, axis=-1, keepdims=True) * inv_cnt            # (tile_co, 1)
    d = y - mu
    var = jnp.sum(d * d, axis=-1, keepdims=True) * inv_cnt       # centered (two-pass)
    scale = gamma_ref[...] * lax.rsqrt(var + BN_EPS)             # (tile_co, 1)

    # --- fused scale/shift + ReLU, single lane-dense store ---
    out_ref[...] = jnp.maximum(d * scale + beta_ref[...], 0.0)


def _adaptive_pool_matrix(in_size, out_size):
    """(out_size, in_size) matrix implementing 1-D AdaptiveAvgPool (PyTorch windowing)."""
    m = np.zeros((out_size, in_size), dtype=np.float32)
    for i in range(out_size):
        s = (i * in_size) // out_size
        e = -((-(i + 1) * in_size) // out_size)  # ceil((i+1)*in/out)
        m[i, s:e] = 1.0 / (e - s)
    return m


def pcbr_forward(x, params, out_size):
    """x: (N, C_in, H, W) f32.  Returns (N, C_out, OH, OW) f32."""
    N, C_in, H, W = x.shape
    OH, OW = out_size
    C_out = params["w"].shape[0]
    S = OH * OW
    HW = H * W

    # Combined 2-D pooling matrix P[(i,j),(h,w)] = Ph[i,h]*Pw[j,w], kept as (H*W, S).
    ph = _adaptive_pool_matrix(H, OH)                              # (OH, H)
    pw = _adaptive_pool_matrix(W, OW)                              # (OW, W)
    p = np.einsum("ih,jw->ijhw", ph, pw).reshape(S, HW)
    pt = jnp.asarray(p.T, dtype=MATMUL_DTYPE)                      # (H*W, S)

    # Layout plumbing (once, by XLA): channels on rows, batch*spatial on lanes.
    x_t = jnp.transpose(x, (1, 0, 2, 3)).reshape(C_in, N * HW).astype(MATMUL_DTYPE)
    w2 = params["w"].reshape(C_out, C_in).astype(MATMUL_DTYPE)
    gamma = params["gamma"].reshape(C_out, 1).astype(jnp.float32)
    beta = params["beta"].reshape(C_out, 1).astype(jnp.float32)
    # NOTE: conv bias is intentionally not passed -- training-mode BN's batch-mean
    # subtraction cancels any per-channel constant exactly.

    # Grid over C_out tiles ("parallel": BN stats are per-channel, tiles independent).
    # Tile rows must be a multiple of 8 or the full extent; at C_out=8 this is 1 step.
    tile_co = C_out
    n_tiles = C_out // tile_co

    flops = 2 * N * C_in * HW * S + 2 * C_out * C_in * N * S
    bytes_accessed = (C_in * N * HW * 2 + HW * S * 2 + C_out * C_in * 2
                      + 2 * C_out * 4 + C_out * N * S * 4)

    out2 = pl.pallas_call(
        _pcbr_kernel,
        out_shape=jax.ShapeDtypeStruct((C_out, N * S), jnp.float32),
        grid=(n_tiles,),
        in_specs=[
            pl.BlockSpec((C_in, N * HW), lambda i: (0, 0)),   # x (shared by all tiles)
            pl.BlockSpec((HW, S), lambda i: (0, 0)),          # pooling matrix
            pl.BlockSpec((tile_co, C_in), lambda i: (i, 0)),  # conv weight rows
            pl.BlockSpec((tile_co, 1), lambda i: (i, 0)),     # gamma
            pl.BlockSpec((tile_co, 1), lambda i: (i, 0)),     # beta
        ],
        out_specs=pl.BlockSpec((tile_co, N * S), lambda i: (i, 0)),
        compiler_params=pltpu.CompilerParams(
            dimension_semantics=("parallel",),
            vmem_limit_bytes=48 * 1024 * 1024),
        cost_estimate=pl.CostEstimate(flops=flops, transcendentals=C_out,
                                      bytes_accessed=bytes_accessed),
    )(x_t, pt, w2, gamma, beta)

    # (C_out, N*S) -> (N, C_out, OH, OW): pure reshape + transpose in the wrapper.
    return jnp.transpose(out2.reshape(C_out, N, OH, OW), (1, 0, 2, 3))


def pcbr_reference(x, params, out_size):
    """Plain-JAX reference with the original module's semantics (bias included)."""
    N, C_in, H, W = x.shape
    OH, OW = out_size
    ph = jnp.asarray(_adaptive_pool_matrix(H, OH))
    pw = jnp.asarray(_adaptive_pool_matrix(W, OW))
    pooled = jnp.einsum("ih,nchw,jw->ncij", ph, x, pw)
    wmat = params["w"].reshape(-1, C_in)
    y = jnp.einsum("oc,ncij->noij", wmat, pooled) + params["b"][None, :, None, None]
    mu = y.mean(axis=(0, 2, 3), keepdims=True)
    var = ((y - mu) ** 2).mean(axis=(0, 2, 3), keepdims=True)
    yn = (y - mu) / jnp.sqrt(var + BN_EPS)
    yn = yn * params["gamma"][None, :, None, None] + params["beta"][None, :, None, None]
    return jnp.maximum(yn, 0.0)


if __name__ == "__main__":
    key = jax.random.PRNGKey(0)
    k_x, k_w, k_b = jax.random.split(key, 3)

    # Small shapes consistent with PCBR(out_size=4, in_plane=4, out_plane=8)
    N, C_in, H, W = 2, 4, 16, 16
    C_out = 8
    out_size = (4, 4)

    x = jax.random.normal(k_x, (N, C_in, H, W), dtype=jnp.float32)

    bound = 1.0 / (C_in ** 0.5)
    params = {
        "w": jax.random.uniform(k_w, (C_out, C_in, 1, 1), jnp.float32, -bound, bound),
        "b": jax.random.uniform(k_b, (C_out,), jnp.float32, -bound, bound),
        "gamma": jnp.ones((C_out,), jnp.float32),   # BatchNorm2d default weight
        "beta": jnp.zeros((C_out,), jnp.float32),   # BatchNorm2d default bias
    }

    out = pcbr_forward(x, params, out_size)
    out = jax.block_until_ready(out)
    assert out.shape == (N, C_out, out_size[0], out_size[1])

    ref = pcbr_reference(x, params, out_size)
    # bf16 MXU operands with f32 accumulation; BN-normalized outputs -> loose tolerance.
    np.testing.assert_allclose(np.asarray(out), np.asarray(ref), rtol=3e-2, atol=3e-2)

    print("KERNEL_OK")
</pallas_src>

<mosaic_0001>
module attributes {stable_mosaic.version = 11 : i64} {
  func.func @_pcbr_kernel(%arg0: i32, %arg1: memref<4x512xbf16, #tpu.memory_space<vmem>>, %arg2: memref<256x16xbf16, #tpu.memory_space<vmem>>, %arg3: memref<8x4xbf16, #tpu.memory_space<vmem>>, %arg4: memref<8x1xf32, #tpu.memory_space<vmem>>, %arg5: memref<8x1xf32, #tpu.memory_space<vmem>>, %arg6: memref<8x32xf32, #tpu.memory_space<vmem>>) attributes {dimension_semantics = [#tpu.dimension_semantics<parallel>], iteration_bounds = array<i64: 1>, scalar_prefetch = 0 : i64, scratch_operands = 0 : i64, tpu.core_type = #tpu.core_type<tc>, window_params = [{pipeline_mode = #tpu.pipeline_mode<synchronous>, transform_indices = @transform_0, window_bounds = array<i64: 4, 512>}, {pipeline_mode = #tpu.pipeline_mode<synchronous>, transform_indices = @transform_1, window_bounds = array<i64: 256, 16>}, {transform_indices = @transform_2, window_bounds = array<i64: 8, 4>}, {transform_indices = @transform_3, window_bounds = array<i64: 8, 1>}, {transform_indices = @transform_4, window_bounds = array<i64: 8, 1>}, {transform_indices = @transform_5, window_bounds = array<i64: 8, 32>}]} {
    %c0 = arith.constant 0 : index
    %c0_0 = arith.constant 0 : index
    %0 = vector.load %arg1[%c0, %c0_0] : memref<4x512xbf16, #tpu.memory_space<vmem>>, vector<4x256xbf16>
    %c0_1 = arith.constant 0 : index
    %c0_2 = arith.constant 0 : index
    %1 = vector.load %arg2[%c0_1, %c0_2] : memref<256x16xbf16, #tpu.memory_space<vmem>>, vector<256x16xbf16>
    %cst = arith.constant dense<0.000000e+00> : vector<4x16xf32>
    %2 = tpu.matmul %0, %1, %cst {dimension_numbers = #tpu.dot_dimension_numbers<[1], [0], [0], [1], [0, 0, 1, 1], [], []>} : vector<4x256xbf16>, vector<256x16xbf16>, vector<4x16xf32> -> vector<4x16xf32>
    %c0_3 = arith.constant 0 : index
    %c256 = arith.constant 256 : index
    %3 = vector.load %arg1[%c0_3, %c256] : memref<4x512xbf16, #tpu.memory_space<vmem>>, vector<4x256xbf16>
    %c0_4 = arith.constant 0 : index
    %c0_5 = arith.constant 0 : index
    %4 = vector.load %arg2[%c0_4, %c0_5] : memref<256x16xbf16, #tpu.memory_space<vmem>>, vector<256x16xbf16>
    %cst_6 = arith.constant dense<0.000000e+00> : vector<4x16xf32>
    %5 = tpu.matmul %3, %4, %cst_6 {dimension_numbers = #tpu.dot_dimension_numbers<[1], [0], [0], [1], [0, 0, 1, 1], [], []>} : vector<4x256xbf16>, vector<256x16xbf16>, vector<4x16xf32> -> vector<4x16xf32>
    %6 = tpu.concatenate %2, %5 in 1 : vector<4x16xf32>, vector<4x16xf32> -> vector<4x32xf32>
    %c0_7 = arith.constant 0 : index
    %c0_8 = arith.constant 0 : index
    %7 = vector.load %arg3[%c0_7, %c0_8] : memref<8x4xbf16, #tpu.memory_space<vmem>>, vector<8x4xbf16>
    %8 = arith.truncf %6 : vector<4x32xf32> to vector<4x32xbf16>
    %cst_9 = arith.constant dense<0.000000e+00> : vector<8x32xf32>
    %9 = tpu.matmul %7, %8, %cst_9 {dimension_numbers = #tpu.dot_dimension_numbers<[1], [0], [0], [1], [0, 0, 1, 1], [], []>} : vector<8x4xbf16>, vector<4x32xbf16>, vector<8x32xf32> -> vector<8x32xf32>
    %cst_10 = arith.constant dense<0.000000e+00> : vector<8xf32>
    %10 = vector.multi_reduction <add>, %9, %cst_10 [1] : vector<8x32xf32> to vector<8xf32>
    %11 = vector.shape_cast %10 : vector<8xf32> to vector<8x1xf32>
    %cst_11 = arith.constant 3.125000e-02 : f32
    %12 = vector.broadcast %cst_11 : f32 to vector<8x1xf32>
    %13 = arith.mulf %11, %12 : vector<8x1xf32>
    %14 = vector.broadcast %13 : vector<8x1xf32> to vector<8x32xf32>
    %15 = arith.subf %9, %14 : vector<8x32xf32>
    %16 = arith.mulf %15, %15 : vector<8x32xf32>
    %cst_12 = arith.constant dense<0.000000e+00> : vector<8xf32>
    %17 = vector.multi_reduction <add>, %16, %cst_12 [1] : vector<8x32xf32> to vector<8xf32>
    %18 = vector.shape_cast %17 : vector<8xf32> to vector<8x1xf32>
    %cst_13 = arith.constant 3.125000e-02 : f32
    %19 = vector.broadcast %cst_13 : f32 to vector<8x1xf32>
    %20 = arith.mulf %18, %19 : vector<8x1xf32>
    %c0_14 = arith.constant 0 : index
    %c0_15 = arith.constant 0 : index
    %21 = vector.load %arg4[%c0_14, %c0_15] : memref<8x1xf32, #tpu.memory_space<vmem>>, vector<8x1xf32>
    %cst_16 = arith.constant 9.99999974E-6 : f32
    %22 = vector.broadcast %cst_16 : f32 to vector<8x1xf32>
    %23 = arith.addf %20, %22 : vector<8x1xf32>
    %24 = math.rsqrt %23 : vector<8x1xf32>
    %25 = arith.mulf %21, %24 : vector<8x1xf32>
    %26 = vector.broadcast %25 : vector<8x1xf32> to vector<8x32xf32>
    %27 = arith.mulf %15, %26 : vector<8x32xf32>
    %c0_17 = arith.constant 0 : index
    %c0_18 = arith.constant 0 : index
    %28 = vector.load %arg5[%c0_17, %c0_18] : memref<8x1xf32, #tpu.memory_space<vmem>>, vector<8x1xf32>
    %29 = vector.broadcast %28 : vector<8x1xf32> to vector<8x32xf32>
    %30 = arith.addf %27, %29 : vector<8x32xf32>
    %cst_19 = arith.constant 0.000000e+00 : f32
    %31 = vector.broadcast %cst_19 : f32 to vector<8x32xf32>
    %32 = arith.maximumf %30, %31 : vector<8x32xf32>
    %c0_20 = arith.constant 0 : index
    %c0_21 = arith.constant 0 : index
    %33 = vector.load %arg6[%c0_20, %c0_21] : memref<8x32xf32, #tpu.memory_space<vmem>>, vector<8x32xf32>
    tpu.vector_store %arg6[%c0_20, %c0_21], %32 {strides = array<i32>} : memref<8x32xf32, #tpu.memory_space<vmem>>, vector<8x32xf32>,
    return
  }
  func.func @transform_0(%arg0: i32) -> (i32, i32) {
    %c0_i32 = arith.constant 0 : i32
    %c0_i32_0 = arith.constant 0 : i32
    %c0_i32_1 = arith.constant 0 : i32
    return %c0_i32, %c0_i32_0 : i32, i32
  }
  func.func @transform_1(%arg0: i32) -> (i32, i32) {
    %c0_i32 = arith.constant 0 : i32
    %c0_i32_0 = arith.constant 0 : i32
    %c0_i32_1 = arith.constant 0 : i32
    return %c0_i32, %c0_i32_0 : i32, i32
  }
  func.func @transform_2(%arg0: i32) -> (i32, i32) {
    %c0_i32 = arith.constant 0 : i32
    %c0_i32_0 = arith.constant 0 : i32
    return %arg0, %c0_i32 : i32, i32
  }
  func.func @transform_3(%arg0: i32) -> (i32, i32) {
    %c0_i32 = arith.constant 0 : i32
    %c0_i32_0 = arith.constant 0 : i32
    return %arg0, %c0_i32 : i32, i32
  }
  func.func @transform_4(%arg0: i32) -> (i32, i32) {
    %c0_i32 = arith.constant 0 : i32
    %c0_i32_0 = arith.constant 0 : i32
    return %arg0, %c0_i32 : i32, i32
  }
  func.func @transform_5(%arg0: i32) -> (i32, i32) {
    %c0_i32 = arith.constant 0 : i32
    %c0_i32_0 = arith.constant 0 : i32
    return %arg0, %c0_i32 : i32, i32
  }
}

</mosaic_0001>

<bundles_post_ra>
// kernel: tpu_custom_call.1
= control target key start
LH: loop header
LB: loop body
LE: loop exit
PB: predicated region body
PF: predicated region fallthrough
CT: control target
= control target key end

     0   :  { %s576_s0 = inlined_call_operand.vmem [shape: bf16[4,512], index: 0, kind: input, shape index: {}]   ;;  %s577_s1 = inlined_call_operand.vmem [shape: bf16[256,16], index: 1, kind: input, shape index: {}]   ;;  %s578_s2 = inlined_call_operand.vmem [shape: bf16[8,4], index: 2, kind: input, shape index: {}]   ;;  %s579_s3 = inlined_call_operand.vmem [shape: f32[8,1], index: 3, kind: input, shape index: {}]   ;;  %s580_s4 = inlined_call_operand.vmem [shape: f32[8,1], index: 4, kind: input, shape index: {}]   ;;  %s581_s5 = inlined_call_operand.hbm [shape: f32[8,32], index: 5, kind: output, shape index: {}]  }
   0x1   :  { %v432_v0 = vld [vmem:[%s577_s1 + $0x78] sm:$0xff]   ;;  %v434_v2 = vld [vmem:[%s577_s1 + $0x70] sm:$0xff]   ;;  %v436_v4 = vld [vmem:[%s577_s1 + $0x68] sm:$0xff]  }
   0x2   :  { %v433_v1 = vld [vmem:[%s577_s1 + $0x38] sm:$0xff]   ;;  %395 = vmatprep.subr.bf16.mxu1 %v432_v0  ;;  %373 = vmatprep.subr.bf16.mxu0 %v432_v0  ;;  %v435_v3 = vld [vmem:[%s577_s1 + $0x30] sm:$0xff]   ;;  %v437_v5 = vld [vmem:[%s577_s1 + $0x28] sm:$0xff]  }
   0x3   :  { %396 = vmatpush3.bf16.msra.mxu1 %v433_v1  ;;  %374 = vmatpush3.bf16.msra.mxu0 %v433_v1  ;;  %v438_v6 = vld [vmem:[%s577_s1 + $0x60] sm:$0xff]   ;;  %v440_v8 = vld [vmem:[%s577_s1 + $0x58] sm:$0xff]   ;;  %v442_v10 = vld [vmem:[%s577_s1 + $0x50] sm:$0xff]  }
   0x4   :  { %397 = vmatprep.subr.bf16.mxu1 %v434_v2  ;;  %375 = vmatprep.subr.bf16.mxu0 %v434_v2  ;;  %v439_v7 = vld [vmem:[%s577_s1 + $0x20] sm:$0xff]   ;;  %v441_v9 = vld [vmem:[%s577_s1 + $0x18] sm:$0xff]  }
   0x5   :  { %v371_v11 = vld.sshfl [vmem:[%s576_s0 + $0x4] sm:$0x33 pattern:$0x76325410] }
   0x7   :  { %398 = vmatpush3.bf16.msra.mxu1 %v435_v3  ;;  %376 = vmatpush3.bf16.msra.mxu0 %v435_v3 }
   0x8   :  { %399 = vmatprep.subr.bf16.mxu1 %v436_v4  ;;  %377 = vmatprep.subr.bf16.mxu0 %v436_v4 }
   0xb   :  { %400 = vmatpush3.bf16.msra.mxu1 %v437_v5  ;;  %378 = vmatpush3.bf16.msra.mxu0 %v437_v5 }
   0xc   :  { %401 = vmatprep.subr.bf16.mxu1 %v438_v6  ;;  %379 = vmatprep.subr.bf16.mxu0 %v438_v6 }
   0xf   :  { %402 = vmatpush3.bf16.msra.mxu1 %v439_v7  ;;  %380 = vmatpush3.bf16.msra.mxu0 %v439_v7 }
  0x10   :  { %403 = vmatprep.subr.bf16.mxu1 %v440_v8  ;;  %381 = vmatprep.subr.bf16.mxu0 %v440_v8 }
  0x11   :  { %10 = vsyncpa [#allocation3], 0  ;;  %v211_v12 = vcombine.high %v371_v11, %v371_v11  ;;  %v354_v13 = vld.sshfl [vmem:[%s576_s0] sm:$0x33 pattern:$0x76325410] }
  0x12   :  { %v63_v14 = vcombine.high %v354_v13, %v354_v13  ;;  %v443_v15 = vld [vmem:[%s577_s1 + $0x10] sm:$0xff]   ;;  %v444_v16 = vld [vmem:[%s577_s1 + $0x48] sm:$0xff]   ;;  %v446_v18 = vld [vmem:[%s577_s1 + $0x40] sm:$0xff]   ;;  %v472_v20 = vmov 0.0   ;;  %vm473_vm0 = vmmov 0   ;;  %s474_s28 = smov 16  }
  0x13   :  { %404 = vmatpush3.bf16.msra.mxu1 %v441_v9  ;;  %246 = vmatprep.mubr.bf16.mxu1 %v211_v12  ;;  %v445_v17 = vld [vmem:[%s577_s1 + $0x8] sm:$0xff]   ;;  %v447_v19 = vld [vmem:[%s577_s1] sm:$0xff]   ;;  %vm258_vm1 = vcmask 130048   ;;  %vm266_vm2 = vcmask 1041408   ;;  %vm262_vm3 = vcmask 31744   ;;  %vm310_vm4 = vcmask 261120  }
  0x14   :  { %405 = vmatprep.subr.bf16.mxu1 %v442_v10  ;;  %382 = vmatpush3.bf16.msra.mxu0 %v441_v9  ;;  %v260_v35 = vld [vmem:[%s578_s2] sm:$0xf]  ;;  %v475_v46 = vmov 0   ;;  %s476_s8 = smov [#allocation2]  }
  0x15   :  { %383 = vmatprep.subr.bf16.mxu0 %v442_v10  ;;  %194 = vmatprep.mubr.bf16.mxu0 %v63_v14  ;;  %v321_v50 = vld [vmem:[%s579_s3] sm:$0xff]  ;;  %s346_s9 = sshll.u32 %s476_s8, 4  ;;  %s347_s9 = int_to_ptr.vmem [resolvable:$true] %s346_s9 }
  0x16   :  { %430 = vset.pattern.permute.xlu1 %v475_v46  ;;  %431 = vset.pattern.permute.xlu0 %v475_v46  ;;  %v331_v53 = vld [vmem:[%s580_s4] sm:$0xff]  ;;  %s450_s10 = scalar_lea.vmem %s347_s9, 128  ;;  %p455_p1 = scmp.lt.s32.totalorder %s347_s9, %s347_s9 }
  0x17   :  { %406 = vmatpush3.bf16.msra.mxu1 %v443_v15  ;;  %p451_p0 = scmp.ne.s32.totalorder %s347_s9, %s450_s10  ;;  %p456_p2 = scmp.lt.s32.totalorder %s450_s10, %s450_s10 }
  0x18   :  { %407 = vmatprep.subr.bf16.mxu1 %v444_v16  ;;  %384 = vmatpush3.bf16.msra.mxu0 %v443_v15 }
  0x19   :  { %385 = vmatprep.subr.bf16.mxu0 %v444_v16  ;;  %p457_p3 = por %p456_p2, %p455_p1 }
  0x1b   :  { %408 = vmatpush3.bf16.msra.mxu1 %v445_v17  ;;  %p458_p4 = pnand %p457_p3, %p451_p0 }
  0x1c   :  { %409 = vmatprep.subr.bf16.mxu1 %v446_v18  ;;  %386 = vmatpush3.bf16.msra.mxu0 %v445_v17 }
  0x1d   :  { %387 = vmatprep.subr.bf16.mxu0 %v446_v18 }
  0x1f   :  { %410 = vmatpush3.bf16.msra.mxu1 %v447_v19 }
  0x20   :  { %388 = vmatpush3.bf16.msra.mxu0 %v447_v19 }
  0x21   :  { %419 = vmatprep.subr.bf16.mxu0 %v472_v20 }
  0x22   :  { %247 = vmatmul.mubr.bf16.vlgmr.msra.gmra.mxu1 %v371_v11 }
  0x23   :  { %195 = vmatmul.mubr.bf16.vlgmr.msra.gmra.mxu0 %v354_v13 }
  0x24   :  { %421 = vmatprep.mubr.msk.bf16.mxu0 %vm473_vm0, %v472_v20 }
  0xe2   :  { %v411_v21 = vpop.f32.mrf.mxu1 }
  0xe3   :  { %v389_v22 = vpop.f32.mrf.mxu0 }
  0xe4   :  { %v412_v23 = vpop.f32.mrf.mxu1 }
  0xe5   :  { %v413_v24 = vadd.f32 %v412_v23, %v411_v21  ;;  %v390_v25 = vpop.f32.mrf.mxu0 }
  0xe6   :  { %v414_v26 = vpop.f32.mrf.mxu1  ;;  %v391_v27 = vadd.f32 %v390_v25, %v389_v22 }
  0xe7   :  { %255 = vrot.lane.b32.xlu0 %v413_v24, %s474_s28  ;;  %v392_v28 = vpop.f32.mrf.mxu0 }
  0xe8   :  { %v415_v29 = vpop.f32.mrf.mxu1 }
  0xe9   :  { %v393_v30 = vpop.f32.mrf.mxu0 }
 0x159   :  { %v256_v31 = vpop.permute.xlu0 %255 }
 0x15a   :  { %v259_v32 = vsel %vm258_vm1, %v391_v27, %v256_v31 }
 0x15b   :  { %v261_v33 = vpack.c.bf16 %v259_v32, %v259_v32 }
 0x15d   :  { %v268_v34 = vsel %vm266_vm2, %v261_v33, 0 }
 0x15e   :  { %420 = vmatpush3.bf16.msra.mxu0 %v268_v34 }
 0x161   :  { %422 = vmatmul.mubr.msk.bf16.vlgmr.msra.gmra.mxu0 %vm262_vm3, %v260_v35 }
 0x221   :  { %v304_v36 = vpop.f32.mrf.mxu0 }
 0x222   :  { %v311_v37 = vsel %vm310_vm4, %v304_v36, 0.0 }
 0x223   :  { %312 = vadd.xlane.f32.xlu0 %v311_v37  ;;  %v423_v38 = vpop.f32.mrf.mxu0 }
 0x225   :  { %v307_v39 = vpop.f32.mrf.mxu0 }
 0x227   :  { %v424_v40 = vpop.f32.mrf.mxu0 }
 0x2ac   :  { %v313_v41 = vpop.xlane.xlu0 %312 }
 0x2ad   :  { %v314_v42 = vmul.f32 0.03125, %v313_v41 }
 0x2af   :  { %v315_v43 = vsub.f32 %v304_v36, %v314_v42 }
 0x2b1   :  { %v316_v44 = vmul.f32 %v315_v43, %v315_v43 }
 0x2b3   :  { %v317_v45 = vsel %vm310_vm4, %v316_v44, 0.0 }
 0x2b4   :  { %318 = vadd.xlane.f32.xlu1 %v317_v45 }
 0x33d   :  { %v319_v47 = vpop.xlane.xlu1 %318 }
 0x33e   :  { %v320_v48 = vmul.f32 0.03125, %v319_v47 }
 0x340   :  { %v322_v49 = vadd.f32 1e-05, %v320_v48 }
 0x342   :  { %448 = vrsqrt.f32 %v322_v49 }
 0x34f   :  { %v449_v51 = vpop.eup %448 }
 0x350   :  { %v324_v52 = vmul.f32 %v449_v51, %v321_v50 }
 0x352   :  { %327 = vperm.xlu1 %430, %v324_v52  }
 0x356   :  { %334 = vperm.xlu1 %430, %v331_v53  }
 0x3cd   :  { %v328_v54 = vpop.permute.xlu1 %327 }
 0x3ce   :  { %v330_v55 = vmul.f32 %v328_v54, %v315_v43 }
 0x3d1   :  { %v335_v56 = vpop.permute.xlu1 %334 }
 0x3d2   :  { %v337_v57 = vadd.f32 %v335_v56, %v330_v55 }
 0x3d4   :  { %v338_v58 = vmax.f32 %v337_v57, 0.0 }
 0x3d6   :  { %339 = vst.msk [vmem:[#allocation2] sm:$0xff] %vm310_vm4, %v338_v58 }
 0x3d7   :  { %461 = shalt.err (!%p458_p4)
}
 0x3d8   :  { %349 = dma.vmem_to_hbm [thread:$0]  %s347_s9, 128, %s581_s5, [#allocation3]  }
 0x3d9   :  { %470 = dma.done.wait [#allocation3], 128  }
 0x3da   :  { %471 = vsyncadd [#allocation3], 4294967168 }
 0x3db   :  { %353 = vsyncpa [#allocation3], 1 }

</bundles_post_ra>
